<compile_context>
chip_gen: v6e
topology: v6e:2x2x1
jax: 0.10.0
libtpu: 0.0.40
codegen_flags: <defaults>
</compile_context>

<pallas_src>
import functools

import jax
import jax.numpy as jnp
from jax.experimental import pallas as pl
from jax.experimental.pallas import tpu as pltpu


# ---------------------------------------------------------------------------
# Fused EvolutionCell kernel: both GraphConv layers + attention, all in VMEM.
# ---------------------------------------------------------------------------
def _evolution_cell_kernel(x_ref, s_ref, w_ref, m_ref, o_ref, *,
                           n_layers, K, B, N):
    BN = B * N

    aw_t = m_ref[0:BN, :]            # [BN, Dout]  att weight tiled over batch
    ones_blk = s_ref[n_layers]       # [BN, BN]    block-diag of ones(N,N)

    cur = x_ref[...]                 # [BN, Fpad]
    outs = []
    logits = []
    for l in range(n_layers):
        s = s_ref[l]                                    # [BN, BN]
        bias = m_ref[BN + 8 * l: BN + 8 * l + 1, :]     # [1, Dout]

        # Chebyshev diffusion over ALL batches at once (block-diagonal support)
        # with the output Linear folded in as a per-metric matmul accumulation.
        x0 = cur
        h = jnp.dot(x0, w_ref[l, 0], preferred_element_type=jnp.float32) + bias
        if K > 1:
            x1 = jnp.dot(s, x0, preferred_element_type=jnp.float32)
            h = h + jnp.dot(x1, w_ref[l, 1], preferred_element_type=jnp.float32)
            s2 = s + s                                  # fold the 2x (exact)
            for k in range(2, K):
                x2 = jnp.dot(s2, x1, preferred_element_type=jnp.float32) - x0
                h = h + jnp.dot(x2, w_ref[l, k],
                                preferred_element_type=jnp.float32)
                x1, x0 = x2, x1
        cur = h                                         # feeds next layer
        outs.append(h)                                  # [BN, Dout]

        # Attention logit for this layer, held per-row (identical within a
        # batch block): lane reduce (XLU) + per-batch sum/broadcast (MXU).
        r = jnp.sum(h * aw_t, axis=1, keepdims=True)    # [BN, 1]
        logits.append(jnp.dot(ones_blk, r, preferred_element_type=jnp.float32))

    # ---- softmax over the layer axis (att_b cancels under softmax) ---------
    m = logits[0]
    for lg in logits[1:]:
        m = jnp.maximum(m, lg)
    exps = [jnp.exp(lg - m) for lg in logits]
    denom = exps[0]
    for e in exps[1:]:
        denom = denom + e
    inv = pl.reciprocal(denom, approx=True)             # EUP slot
    inv = inv * (2.0 - denom * inv)                     # 1 Newton step -> f32

    out = (exps[0] * inv) * outs[0]
    for e, h in zip(exps[1:], outs[1:]):
        out = out + (e * inv) * h
    o_ref[...] = out.astype(o_ref.dtype)                # [BN, Dout]


# ---------------------------------------------------------------------------
# Hoisted parameter preparation (do ONCE, outside the RNN time loop).
# ---------------------------------------------------------------------------
def prepare_evolution_cell_params(supports, params, max_step, batch_size):
    """Pack torch-layout parameters + supports into 3 kernel operands."""
    gc_params = params["graphconv"]
    L = len(gc_params)
    d_out = gc_params[0][0].shape[0]
    K = max_step + 1                       # n_supports == 1 per layer
    d_in0 = gc_params[0][0].shape[1] // K
    assert d_in0 <= d_out, "layer-0 input dim must be <= output dim"
    f_pad = d_out
    N = params["att_w"].shape[-1] // d_out
    B = batch_size
    BN = B * N

    # Block-diagonal supports (one per layer) + one block-of-ones plane used by
    # the attention epilogue for the per-batch logit reduction/broadcast.
    eye_b = jnp.eye(B, dtype=jnp.float32)
    planes = [jnp.kron(eye_b, s.astype(jnp.float32)) for s in supports[:L]]
    planes.append(jnp.kron(eye_b, jnp.ones((N, N), jnp.float32)))
    supports_blk = jnp.stack(planes, axis=0)                 # [L+1, BN, BN]

    # torch Linear weight [Dout, Din*K] with col = d*K + k  ->  [K, Fpad, Dout]
    # planes (zero-padded on the channel rows for layer 0).
    w_planes = []
    for w, _b in gc_params:
        d_in = w.shape[1] // K
        wk = (w.astype(jnp.float32)
               .reshape(d_out, d_in, K)
               .transpose(2, 1, 0))                          # [K, Din, Dout]
        wk = jnp.zeros((K, f_pad, d_out), jnp.float32).at[:, :d_in, :].set(wk)
        w_planes.append(wk)
    w_all = jnp.stack(w_planes, axis=0)                      # [L, K, Fpad, Dout]

    # Misc slab: rows 0:BN = att_w (reshaped [N, Dout]) tiled over batch,
    # row BN + 8*l = bias_l (8-aligned row offsets).  att_b is intentionally
    # dropped: the same bias on every layer logit cancels in the softmax.
    misc = jnp.zeros((BN + 8 * L, d_out), jnp.float32)
    aw = params["att_w"].astype(jnp.float32).reshape(N, d_out)
    misc = misc.at[:BN, :].set(jnp.tile(aw, (B, 1)))
    for l, (_w, b) in enumerate(gc_params):
        misc = misc.at[BN + 8 * l, :].set(b.astype(jnp.float32))

    return dict(supports_blk=supports_blk, w_all=w_all, misc=misc,
                n_layers=L, K=K, B=B, N=N, d_out=d_out, f_pad=f_pad)


def evolution_cell_pallas(inputs, prep):
    """inputs: [B, N, Din] -> [B, N, Dout]; `prep` from prepare_evolution_cell_params."""
    B, N, d_in = inputs.shape
    assert B == prep["B"] and N == prep["N"]
    f_pad, d_out = prep["f_pad"], prep["d_out"]
    BN = B * N

    x2d = inputs.astype(jnp.float32).reshape(BN, d_in)
    if d_in < f_pad:
        x2d = jnp.pad(x2d, ((0, 0), (0, f_pad - d_in)))

    kernel = functools.partial(_evolution_cell_kernel,
                               n_layers=prep["n_layers"], K=prep["K"],
                               B=B, N=N)
    out2d = pl.pallas_call(
        kernel,
        out_shape=jax.ShapeDtypeStruct((BN, d_out), jnp.float32),
        compiler_params=pltpu.CompilerParams(
            vmem_limit_bytes=32 * 1024 * 1024),
    )(x2d, prep["supports_blk"], prep["w_all"], prep["misc"])
    return out2d.reshape(B, N, d_out)


# ---------------------------------------------------------------------------
# Pure-JAX reference (mirrors the PyTorch module exactly).
# ---------------------------------------------------------------------------
def _graphconv_ref(x, support, w, b, max_step):
    B, N, Din = x.shape
    x0 = x
    metrics = [x0]
    if max_step > 0:
        x1 = jnp.einsum("nm,bmd->bnd", support, x0)
        metrics.append(x1)
        for _ in range(2, max_step + 1):
            x2 = 2.0 * jnp.einsum("nm,bmd->bnd", support, x1) - x0
            metrics.append(x2)
            x1, x0 = x2, x1
    feat = jnp.stack(metrics, axis=-1).reshape(B, N, -1)  # (d, k) order == torch
    return feat @ w.T + b


def evolution_cell_ref(inputs, supports, params, max_step):
    outputs = []
    x = inputs
    for i, (w, b) in enumerate(params["graphconv"]):
        x = _graphconv_ref(x, supports[i], w, b, max_step)
        outputs.append(x)
    stacked = jnp.stack(outputs, axis=1)               # [B, layer, N, Dout]
    B, G, N, Fd = stacked.shape
    xf = stacked.reshape(B, G, -1)
    logits = xf @ params["att_w"].T + params["att_b"]  # [B, G, 1]
    wgt = jax.nn.softmax(logits, axis=1)
    return (xf * wgt).sum(axis=1).reshape(B, N, Fd)


if __name__ == "__main__":
    # EvolutionCell(input_dim=4, output_dim=32, num_nodes=16,
    #               n_supports=1, max_step=2, layer=2, n_dim=...)
    B, N = 2, 16
    Din, Dout = 4, 32
    max_step, layer = 2, 2
    K = max_step + 1

    key = jax.random.PRNGKey(0)
    ks = jax.random.split(key, 8)

    inputs = jax.random.normal(ks[0], (B, N, Din), jnp.float32)

    # Dense, row-normalized "supports" (torch uses sparse mm; dense equivalent).
    supports = []
    for i in range(layer):
        a = jax.random.uniform(ks[1 + i], (N, N), jnp.float32) + 0.1
        supports.append(a / jnp.sum(a, axis=-1, keepdims=True))

    # Deterministic synthetic parameters (torch Linear layouts).
    gc_params = [
        (0.1 * jax.random.normal(ks[3], (Dout, Din * K), jnp.float32),
         0.01 * jax.random.normal(ks[4], (Dout,), jnp.float32)),
        (0.1 * jax.random.normal(ks[5], (Dout, Dout * K), jnp.float32),
         0.01 * jax.random.normal(ks[6], (Dout,), jnp.float32)),
    ]
    att_w = 0.05 * jax.random.normal(ks[7], (1, N * Dout), jnp.float32)
    att_b = jnp.zeros((1,), jnp.float32)
    params = {"graphconv": gc_params, "att_w": att_w, "att_b": att_b}

    # Parameter / support re-layout hoisted out of the per-step call
    # (an RNN cell is typically scanned over T time steps).
    prep = prepare_evolution_cell_params(supports, params, max_step,
                                         batch_size=B)

    out = evolution_cell_pallas(inputs, prep)
    out = jax.block_until_ready(out)

    ref = evolution_cell_ref(inputs, supports, params, max_step)
    assert out.shape == (B, N, Dout)
    err = jnp.max(jnp.abs(out - ref))
    assert jnp.allclose(out, ref, atol=1e-4, rtol=1e-4), f"max abs err {err}"

    print("KERNEL_OK")
</pallas_src>

<mosaic_0001>
module attributes {stable_mosaic.version = 11 : i64} {
  func.func @_evolution_cell_kernel(%arg0: memref<32x32xf32, #tpu.memory_space<vmem>>, %arg1: memref<3x32x32xf32, #tpu.memory_space<vmem>>, %arg2: memref<2x3x32x32xf32, #tpu.memory_space<vmem>>, %arg3: memref<48x32xf32, #tpu.memory_space<vmem>>, %arg4: memref<32x32xf32, #tpu.memory_space<vmem>>) attributes {dimension_semantics = [], scalar_prefetch = 0 : i64, scratch_operands = 0 : i64, tpu.core_type = #tpu.core_type<tc>} {
    %c0 = arith.constant 0 : index
    %c0_0 = arith.constant 0 : index
    %0 = vector.load %arg3[%c0, %c0_0] : memref<48x32xf32, #tpu.memory_space<vmem>>, vector<32x32xf32>
    %c2 = arith.constant 2 : index
    %c0_1 = arith.constant 0 : index
    %c0_2 = arith.constant 0 : index
    %1 = vector.load %arg1[%c2, %c0_1, %c0_2] : memref<3x32x32xf32, #tpu.memory_space<vmem>>, vector<1x32x32xf32>
    %2 = vector.shape_cast %1 : vector<1x32x32xf32> to vector<32x32xf32>
    %c0_3 = arith.constant 0 : index
    %c0_4 = arith.constant 0 : index
    %3 = vector.load %arg0[%c0_3, %c0_4] : memref<32x32xf32, #tpu.memory_space<vmem>>, vector<32x32xf32>
    %c0_5 = arith.constant 0 : index
    %c0_6 = arith.constant 0 : index
    %c0_7 = arith.constant 0 : index
    %4 = vector.load %arg1[%c0_5, %c0_6, %c0_7] : memref<3x32x32xf32, #tpu.memory_space<vmem>>, vector<1x32x32xf32>
    %5 = vector.shape_cast %4 : vector<1x32x32xf32> to vector<32x32xf32>
    %c32 = arith.constant 32 : index
    %c0_8 = arith.constant 0 : index
    %6 = vector.load %arg3[%c32, %c0_8] : memref<48x32xf32, #tpu.memory_space<vmem>>, vector<1x32xf32>
    %c0_9 = arith.constant 0 : index
    %c0_10 = arith.constant 0 : index
    %c0_11 = arith.constant 0 : index
    %c0_12 = arith.constant 0 : index
    %7 = vector.load %arg2[%c0_9, %c0_10, %c0_11, %c0_12] : memref<2x3x32x32xf32, #tpu.memory_space<vmem>>, vector<1x1x32x32xf32>
    %8 = vector.shape_cast %7 : vector<1x1x32x32xf32> to vector<32x32xf32>
    %cst = arith.constant dense<0.000000e+00> : vector<32x32xf32>
    %9 = tpu.matmul %3, %8, %cst {dimension_numbers = #tpu.dot_dimension_numbers<[1], [0], [0], [1], [0, 0, 1, 1], [], []>} : vector<32x32xf32>, vector<32x32xf32>, vector<32x32xf32> -> vector<32x32xf32>
    %10 = vector.broadcast %6 : vector<1x32xf32> to vector<32x32xf32>
    %11 = arith.addf %9, %10 : vector<32x32xf32>
    %cst_13 = arith.constant dense<0.000000e+00> : vector<32x32xf32>
    %12 = tpu.matmul %5, %3, %cst_13 {dimension_numbers = #tpu.dot_dimension_numbers<[1], [0], [0], [1], [0, 0, 1, 1], [], []>} : vector<32x32xf32>, vector<32x32xf32>, vector<32x32xf32> -> vector<32x32xf32>
    %c0_14 = arith.constant 0 : index
    %c1 = arith.constant 1 : index
    %c0_15 = arith.constant 0 : index
    %c0_16 = arith.constant 0 : index
    %13 = vector.load %arg2[%c0_14, %c1, %c0_15, %c0_16] : memref<2x3x32x32xf32, #tpu.memory_space<vmem>>, vector<1x1x32x32xf32>
    %14 = vector.shape_cast %13 : vector<1x1x32x32xf32> to vector<32x32xf32>
    %cst_17 = arith.constant dense<0.000000e+00> : vector<32x32xf32>
    %15 = tpu.matmul %12, %14, %cst_17 {dimension_numbers = #tpu.dot_dimension_numbers<[1], [0], [0], [1], [0, 0, 1, 1], [], []>} : vector<32x32xf32>, vector<32x32xf32>, vector<32x32xf32> -> vector<32x32xf32>
    %16 = arith.addf %11, %15 : vector<32x32xf32>
    %17 = arith.addf %5, %5 : vector<32x32xf32>
    %cst_18 = arith.constant dense<0.000000e+00> : vector<32x32xf32>
    %18 = tpu.matmul %17, %12, %cst_18 {dimension_numbers = #tpu.dot_dimension_numbers<[1], [0], [0], [1], [0, 0, 1, 1], [], []>} : vector<32x32xf32>, vector<32x32xf32>, vector<32x32xf32> -> vector<32x32xf32>
    %19 = arith.subf %18, %3 : vector<32x32xf32>
    %c0_19 = arith.constant 0 : index
    %c2_20 = arith.constant 2 : index
    %c0_21 = arith.constant 0 : index
    %c0_22 = arith.constant 0 : index
    %20 = vector.load %arg2[%c0_19, %c2_20, %c0_21, %c0_22] : memref<2x3x32x32xf32, #tpu.memory_space<vmem>>, vector<1x1x32x32xf32>
    %21 = vector.shape_cast %20 : vector<1x1x32x32xf32> to vector<32x32xf32>
    %cst_23 = arith.constant dense<0.000000e+00> : vector<32x32xf32>
    %22 = tpu.matmul %19, %21, %cst_23 {dimension_numbers = #tpu.dot_dimension_numbers<[1], [0], [0], [1], [0, 0, 1, 1], [], []>} : vector<32x32xf32>, vector<32x32xf32>, vector<32x32xf32> -> vector<32x32xf32>
    %23 = arith.addf %16, %22 : vector<32x32xf32>
    %24 = arith.mulf %23, %0 : vector<32x32xf32>
    %cst_24 = arith.constant dense<0.000000e+00> : vector<32xf32>
    %25 = vector.multi_reduction <add>, %24, %cst_24 [1] : vector<32x32xf32> to vector<32xf32>
    %26 = vector.shape_cast %25 : vector<32xf32> to vector<32x1xf32>
    %cst_25 = arith.constant dense<0.000000e+00> : vector<32x1xf32>
    %27 = tpu.matmul %2, %26, %cst_25 {dimension_numbers = #tpu.dot_dimension_numbers<[1], [0], [0], [1], [0, 0, 1, 1], [], []>} : vector<32x32xf32>, vector<32x1xf32>, vector<32x1xf32> -> vector<32x1xf32>
    %c1_26 = arith.constant 1 : index
    %c0_27 = arith.constant 0 : index
    %c0_28 = arith.constant 0 : index
    %28 = vector.load %arg1[%c1_26, %c0_27, %c0_28] : memref<3x32x32xf32, #tpu.memory_space<vmem>>, vector<1x32x32xf32>
    %29 = vector.shape_cast %28 : vector<1x32x32xf32> to vector<32x32xf32>
    %c40 = arith.constant 40 : index
    %c0_29 = arith.constant 0 : index
    %30 = vector.load %arg3[%c40, %c0_29] : memref<48x32xf32, #tpu.memory_space<vmem>>, vector<1x32xf32>
    %c1_30 = arith.constant 1 : index
    %c0_31 = arith.constant 0 : index
    %c0_32 = arith.constant 0 : index
    %c0_33 = arith.constant 0 : index
    %31 = vector.load %arg2[%c1_30, %c0_31, %c0_32, %c0_33] : memref<2x3x32x32xf32, #tpu.memory_space<vmem>>, vector<1x1x32x32xf32>
    %32 = vector.shape_cast %31 : vector<1x1x32x32xf32> to vector<32x32xf32>
    %cst_34 = arith.constant dense<0.000000e+00> : vector<32x32xf32>
    %33 = tpu.matmul %23, %32, %cst_34 {dimension_numbers = #tpu.dot_dimension_numbers<[1], [0], [0], [1], [0, 0, 1, 1], [], []>} : vector<32x32xf32>, vector<32x32xf32>, vector<32x32xf32> -> vector<32x32xf32>
    %34 = vector.broadcast %30 : vector<1x32xf32> to vector<32x32xf32>
    %35 = arith.addf %33, %34 : vector<32x32xf32>
    %cst_35 = arith.constant dense<0.000000e+00> : vector<32x32xf32>
    %36 = tpu.matmul %29, %23, %cst_35 {dimension_numbers = #tpu.dot_dimension_numbers<[1], [0], [0], [1], [0, 0, 1, 1], [], []>} : vector<32x32xf32>, vector<32x32xf32>, vector<32x32xf32> -> vector<32x32xf32>
    %c1_36 = arith.constant 1 : index
    %c1_37 = arith.constant 1 : index
    %c0_38 = arith.constant 0 : index
    %c0_39 = arith.constant 0 : index
    %37 = vector.load %arg2[%c1_36, %c1_37, %c0_38, %c0_39] : memref<2x3x32x32xf32, #tpu.memory_space<vmem>>, vector<1x1x32x32xf32>
    %38 = vector.shape_cast %37 : vector<1x1x32x32xf32> to vector<32x32xf32>
    %cst_40 = arith.constant dense<0.000000e+00> : vector<32x32xf32>
    %39 = tpu.matmul %36, %38, %cst_40 {dimension_numbers = #tpu.dot_dimension_numbers<[1], [0], [0], [1], [0, 0, 1, 1], [], []>} : vector<32x32xf32>, vector<32x32xf32>, vector<32x32xf32> -> vector<32x32xf32>
    %40 = arith.addf %35, %39 : vector<32x32xf32>
    %41 = arith.addf %29, %29 : vector<32x32xf32>
    %cst_41 = arith.constant dense<0.000000e+00> : vector<32x32xf32>
    %42 = tpu.matmul %41, %36, %cst_41 {dimension_numbers = #tpu.dot_dimension_numbers<[1], [0], [0], [1], [0, 0, 1, 1], [], []>} : vector<32x32xf32>, vector<32x32xf32>, vector<32x32xf32> -> vector<32x32xf32>
    %43 = arith.subf %42, %23 : vector<32x32xf32>
    %c1_42 = arith.constant 1 : index
    %c2_43 = arith.constant 2 : index
    %c0_44 = arith.constant 0 : index
    %c0_45 = arith.constant 0 : index
    %44 = vector.load %arg2[%c1_42, %c2_43, %c0_44, %c0_45] : memref<2x3x32x32xf32, #tpu.memory_space<vmem>>, vector<1x1x32x32xf32>
    %45 = vector.shape_cast %44 : vector<1x1x32x32xf32> to vector<32x32xf32>
    %cst_46 = arith.constant dense<0.000000e+00> : vector<32x32xf32>
    %46 = tpu.matmul %43, %45, %cst_46 {dimension_numbers = #tpu.dot_dimension_numbers<[1], [0], [0], [1], [0, 0, 1, 1], [], []>} : vector<32x32xf32>, vector<32x32xf32>, vector<32x32xf32> -> vector<32x32xf32>
    %47 = arith.addf %40, %46 : vector<32x32xf32>
    %48 = arith.mulf %47, %0 : vector<32x32xf32>
    %cst_47 = arith.constant dense<0.000000e+00> : vector<32xf32>
    %49 = vector.multi_reduction <add>, %48, %cst_47 [1] : vector<32x32xf32> to vector<32xf32>
    %50 = vector.shape_cast %49 : vector<32xf32> to vector<32x1xf32>
    %cst_48 = arith.constant dense<0.000000e+00> : vector<32x1xf32>
    %51 = tpu.matmul %2, %50, %cst_48 {dimension_numbers = #tpu.dot_dimension_numbers<[1], [0], [0], [1], [0, 0, 1, 1], [], []>} : vector<32x32xf32>, vector<32x1xf32>, vector<32x1xf32> -> vector<32x1xf32>
    %52 = arith.maximumf %27, %51 : vector<32x1xf32>
    %53 = arith.subf %27, %52 : vector<32x1xf32>
    %54 = math.exp %53 : vector<32x1xf32>
    %55 = arith.subf %51, %52 : vector<32x1xf32>
    %56 = math.exp %55 : vector<32x1xf32>
    %57 = arith.addf %54, %56 : vector<32x1xf32>
    %58 = tpu.reciprocal %57 {approx = true} : vector<32x1xf32> -> vector<32x1xf32>
    %59 = arith.mulf %57, %58 : vector<32x1xf32>
    %cst_49 = arith.constant 2.000000e+00 : f32
    %60 = vector.broadcast %cst_49 : f32 to vector<32x1xf32>
    %61 = arith.subf %60, %59 : vector<32x1xf32>
    %62 = arith.mulf %58, %61 : vector<32x1xf32>
    %63 = arith.mulf %54, %62 : vector<32x1xf32>
    %64 = vector.broadcast %63 : vector<32x1xf32> to vector<32x32xf32>
    %65 = arith.mulf %64, %23 : vector<32x32xf32>
    %66 = arith.mulf %56, %62 : vector<32x1xf32>
    %67 = vector.broadcast %66 : vector<32x1xf32> to vector<32x32xf32>
    %68 = arith.mulf %67, %47 : vector<32x32xf32>
    %69 = arith.addf %65, %68 : vector<32x32xf32>
    %c0_50 = arith.constant 0 : index
    %c0_51 = arith.constant 0 : index
    %70 = vector.load %arg4[%c0_50, %c0_51] : memref<32x32xf32, #tpu.memory_space<vmem>>, vector<32x32xf32>
    tpu.vector_store %arg4[%c0_50, %c0_51], %69 {strides = array<i32>} : memref<32x32xf32, #tpu.memory_space<vmem>>, vector<32x32xf32>,
    return
  }
}

</mosaic_0001>

<bundles_post_ra>
// kernel: tpu_custom_call.1
= control target key start
LH: loop header
LB: loop body
LE: loop exit
PB: predicated region body
PF: predicated region fallthrough
CT: control target
= control target key end

     0   :  { %9 = vsyncpa [#allocation3], 0  ;;  %s2125_s0 = inlined_call_operand.vmem [shape: f32[32,32], index: 0, kind: input, shape index: {}]   ;;  %s2126_s1 = inlined_call_operand.hbm [shape: f32[3,32,32], index: 1, kind: input, shape index: {}]   ;;  %s2127_s2 = inlined_call_operand.hbm [shape: f32[2,3,32,32], index: 2, kind: input, shape index: {}]   ;;  %s2128_s3 = inlined_call_operand.vmem [shape: f32[48,32], index: 3, kind: input, shape index: {}]   ;;  %s2129_s4 = inlined_call_operand.hbm [shape: f32[32,32], index: 4, kind: output, shape index: {}]  }
   0x1   :  { %10 = vsyncpa [#allocation6], 0 }
   0x2   :  { %11 = vsyncpa [#allocation4], 0  ;;  %s1866_s15 = smov [#allocation2]  }
   0x3   :  { %s19_s16 = sshll.u32 %s1866_s15, 4  ;;  %s20_s16 = int_to_ptr.vmem [resolvable:$true] %s19_s16 }
   0x4   :  { %s1808_s17 = scalar_lea.vmem %s20_s16, 1536  ;;  %p1813_p1 = scmp.lt.s32.totalorder %s20_s16, %s20_s16 }
   0x5   :  { %p1809_p0 = scmp.ne.s32.totalorder %s20_s16, %s1808_s17  ;;  %p1814_p2 = scmp.lt.s32.totalorder %s1808_s17, %s1808_s17 }
   0x7   :  { %p1815_p3 = por %p1814_p2, %p1813_p1 }
   0x9   :  { %p1816_p4 = pnand %p1815_p3, %p1809_p0 }
   0xb   :  { %1819 = shalt.err (!%p1816_p4)
}
   0xc   :  { %s1867_s18 = smov 128   ;;  %s1868_s19 = smov 8  }
   0xd   :  { %25 = dma.hbm_to_vmem [thread:$0]  %s2126_s1, 1536, %s20_s16, [#allocation3], %s1867_s18, %s1867_s18, %s1868_s19  }
   0xe   :  { %s1869_s22 = smov [#allocation5]  }
   0xf   :  { %s31_s23 = sshll.u32 %s1869_s22, 4  ;;  %s32_s23 = int_to_ptr.vmem [resolvable:$true] %s31_s23 }
  0x10   :  { %s1828_s24 = scalar_lea.vmem %s32_s23, 3072  ;;  %p1833_p6 = scmp.lt.s32.totalorder %s32_s23, %s32_s23 }
  0x11   :  { %p1829_p5 = scmp.ne.s32.totalorder %s32_s23, %s1828_s24  ;;  %p1834_p7 = scmp.lt.s32.totalorder %s1828_s24, %s1828_s24 }
  0x13   :  { %p1835_p8 = por %p1834_p7, %p1833_p6 }
  0x15   :  { %p1836_p9 = pnand %p1835_p8, %p1829_p5 }
  0x17   :  { %1839 = shalt.err (!%p1836_p9)
}
  0x18   :  { %37 = dma.hbm_to_vmem [thread:$0]  %s2127_s2, 3072, %s32_s23, [#allocation6], %s1867_s18, %s1867_s18, %s1868_s19  }
  0x19   :  { %1860 = dma.done.wait [#allocation3], 1536  }
  0x1a   :  { %1861 = vsyncadd [#allocation3], 4294965760 }
  0x1b   :  { %1862 = dma.done.wait [#allocation6], 3072  }
  0x1c   :  { %1863 = vsyncadd [#allocation6], 4294964224  ;;  %vm72_vm0 = vcmask 261120   ;;  %v1912_v0 = vld [vmem:[%s2125_s0 + $0x18] sm:$0xff]  ;;  %v1917_v1 = vld [vmem:[%s2125_s0 + $0x10] sm:$0xff] }
  0x1d   :  { %1614 = vmatprep.subr.mxu1 %v1912_v0  ;;  %v59_v2 = vld [vmem:[#allocation2] sm:$0xff]  ;;  %v1924_v3 = vld [vmem:[%s2125_s0 + $0x8] sm:$0xff]  ;;  %v67_v4 = vld [vmem:[#allocation5 + $0x18] sm:$0xff] }
  0x1e   :  { %1615 = vmatpush3.msra.mxu1 %v1912_v0  ;;  %1622 = vmatprep.mubr.msk.f32.mxu1 %vm72_vm0, %v59_v2  ;;  %v66_v5 = vld [vmem:[#allocation5 + $0x10] sm:$0xff]  ;;  %v1932_v6 = vld [vmem:[%s2125_s0] sm:$0xff]  ;;  %v65_v7 = vld [vmem:[#allocation5 + $0x8] sm:$0xff]  ;;  %v373_v13 = vadd.f32 %v59_v2, %v59_v2 }
  0x1f   :  { %1616 = vmatprep.subr.mxu1 %v1917_v1  ;;  %1600 = vmatprep.subr.mxu0 %v67_v4  ;;  %v60_v8 = vld [vmem:[#allocation2 + $0x8] sm:$0xff]  ;;  %v64_v9 = vld [vmem:[#allocation5] sm:$0xff]  ;;  %v61_v10 = vld [vmem:[#allocation2 + $0x10] sm:$0xff] }
  0x20   :  { %1617 = vmatpush3.msra.mxu1 %v1917_v1  ;;  %1601 = vmatpush3.msra.mxu0 %v67_v4  ;;  %v271_v11 = vld [vmem:[#allocation5 + $0x38] sm:$0xff]  ;;  %v270_v14 = vld [vmem:[#allocation5 + $0x30] sm:$0xff]  ;;  %v269_v15 = vld [vmem:[#allocation5 + $0x28] sm:$0xff]  ;;  %v374_v21 = vadd.f32 %v60_v8, %v60_v8  ;;  %v375_v22 = vadd.f32 %v61_v10, %v61_v10 }
  0x21   :  { %1618 = vmatprep.subr.mxu1 %v1924_v3  ;;  %1602 = vmatprep.subr.mxu0 %v66_v5  ;;  %v62_v12 = vld [vmem:[#allocation2 + $0x18] sm:$0xff]  ;;  %v268_v16 = vld [vmem:[#allocation5 + $0x20] sm:$0xff]  ;;  %v481_v25 = vld [vmem:[#allocation5 + $0x50] sm:$0xff] }
  0x22   :  { %1619 = vmatpush3.msra.mxu1 %v1924_v3  ;;  %1603 = vmatpush3.msra.mxu0 %v66_v5  ;;  %v376_v23 = vadd.f32 %v62_v12, %v62_v12  ;;  %v482_v24 = vld [vmem:[#allocation5 + $0x58] sm:$0xff]  ;;  %v480_v26 = vld [vmem:[#allocation5 + $0x48] sm:$0xff]  ;;  %v479_v27 = vld [vmem:[#allocation5 + $0x40] sm:$0xff] }
  0x23   :  { %1620 = vmatprep.subr.mxu1 %v1932_v6  ;;  %1604 = vmatprep.subr.mxu0 %v65_v7  ;;  %v707_v28 = vld [vmem:[#allocation5 + $0x78] sm:$0xff]  ;;  %v706_v37 = vld [vmem:[#allocation5 + $0x70] sm:$0xff]  ;;  %v705_v38 = vld [vmem:[#allocation5 + $0x68] sm:$0xff] }
  0x24   :  { %1621 = vmatpush3.msra.mxu1 %v1932_v6  ;;  %1605 = vmatpush3.msra.mxu0 %v65_v7  ;;  %v704_v39 = vld [vmem:[#allocation5 + $0x60] sm:$0xff]  ;;  %v1971_v54 = vld [vmem:[%s2128_s3 + $0x8] sm:$0xff] }
  0x25   :  { %1623 = vmatmul.mubr.msk.f32.vlgmr.msra.gmra.mxu1 %vm72_vm0, %v60_v8  ;;  %1606 = vmatprep.subr.mxu0 %v64_v9  ;;  %v1454_v46 = vld [vmem:[%s2128_s3 + $0x20] ss:$0 sm:$0xff] }
  0x26   :  { %1625 = vmatprep.mubr.msk.f32.mxu1 %vm72_vm0, %v61_v10  ;;  %1607 = vmatpush3.msra.mxu0 %v64_v9  ;;  %v1982_v62 = vld [vmem:[%s2128_s3] sm:$0xff] }
  0x27   :  { %1608 = vmatprep.mubr.msk.f32.mxu0 %vm72_vm0, %v1932_v6  ;;  %1628 = vmatprep.subr.mxu0 %v271_v11 }
  0x28   :  { %1609 = vmatmul.mubr.msk.f32.vlgmr.msra.gmra.mxu0 %vm72_vm0, %v1924_v3 }
  0x29   :  { %1626 = vmatmul.mubr.msk.f32.gmra.mxu1 %vm72_vm0, %v62_v12  ;;  %1629 = vmatpush3.msra.mxu0 %v271_v11 }
  0x2a   :  { %1630 = vmatprep.subr.mxu0 %v270_v14  ;;  %1611 = vmatprep.mubr.msk.f32.mxu0 %vm72_vm0, %v1917_v1 }
  0x2b   :  { %1631 = vmatpush3.msra.mxu0 %v270_v14  ;;  %1650 = vmatprep.mubr.msk.f32.mxu1 %vm72_vm0, %v373_v13  ;;  %v2016_v13 = vld [vmem:[#allocation2 + $0x40] sm:$0xff] }
  0x2c   :  { %1612 = vmatmul.mubr.msk.f32.gmra.mxu0 %vm72_vm0, %v1912_v0  ;;  %1632 = vmatprep.subr.mxu0 %v269_v15 }
  0x2d   :  { %1633 = vmatpush3.msra.mxu0 %v269_v15 }
  0x2e   :  { %1634 = vmatprep.subr.mxu0 %v268_v16 }
  0x2f   :  { %1635 = vmatpush3.msra.mxu0 %v268_v16 }
  0x30   :  { %1656 = vmatprep.subr.mxu0 %v482_v24 }
  0xe5   :  { %v1624_v17 = vpop.f32.mrf.mxu1 }
  0xe7   :  { %v248_v18 = vpop.f32.mrf.mxu1 }
  0xe8   :  { %1636 = vmatprep.mubr.msk.f32.mxu0 %vm72_vm0, %v248_v18  ;;  %v1610_v40 = vpop.f32.mrf.mxu0 }
  0xe9   :  { %v1627_v19 = vpop.f32.mrf.mxu1  ;;  %1637 = vmatmul.mubr.msk.f32.vlgmr.msra.gmra.mxu0 %vm72_vm0, %v1624_v17  ;;  %v157_v48 = vadd.f32 %v1610_v40, %v1454_v46 }
  0xea   :  { %1642 = vmatprep.subr.mxu1 %v1627_v19  ;;  %1657 = vmatpush3.msra.mxu0 %v482_v24  ;;  %v151_v41 = vpop.f32.mrf.mxu0 }
  0xeb   :  { %v258_v20 = vpop.f32.mrf.mxu1  ;;  %1643 = vmatpush3.msra.mxu1 %v1627_v19  ;;  %1658 = vmatprep.subr.mxu0 %v481_v25  ;;  %v152_v49 = vadd.f32 %v1454_v46, %v151_v41  ;;  %v1121_v41 = vld [vmem:[#allocation5 + $0xb8] sm:$0xff] }
  0xec   :  { %1639 = vmatprep.mubr.msk.f32.mxu0 %vm72_vm0, %v258_v20  ;;  %1644 = vmatprep.subr.mxu1 %v258_v20  ;;  %v1613_v42 = vpop.f32.mrf.mxu0 }
  0xed   :  { %1640 = vmatmul.mubr.msk.f32.gmra.mxu0 %vm72_vm0, %v1627_v19  ;;  %1645 = vmatpush3.msra.mxu1 %v258_v20  ;;  %v167_v51 = vadd.f32 %v1613_v42, %v1454_v46  ;;  %v2022_v19 = vld [vmem:[#allocation2 + $0x50] sm:$0xff]  ;;  %v2030_v20 = vld [vmem:[#allocation2 + $0x58] sm:$0xff] }
  0xee   :  { %1646 = vmatprep.subr.mxu1 %v1624_v17  ;;  %1659 = vmatpush3.msra.mxu0 %v481_v25  ;;  %v161_v43 = vpop.f32.mrf.mxu0  ;;  %v701_v25 = vld [vmem:[#allocation2 + $0x38] sm:$0xff]  ;;  %v1120_v42 = vld [vmem:[#allocation5 + $0xb0] sm:$0xff] }
  0xef   :  { %1647 = vmatpush3.msra.mxu1 %v1624_v17  ;;  %1660 = vmatprep.subr.mxu0 %v480_v26  ;;  %v162_v55 = vadd.f32 %v1454_v46, %v161_v43  ;;  %v1015_v40 = vadd.f32 %v701_v25, %v701_v25  ;;  %v1119_v43 = vld [vmem:[#allocation5 + $0xa8] sm:$0xff] }
  0xf0   :  { %1648 = vmatprep.subr.mxu1 %v248_v18  ;;  %1661 = vmatpush3.msra.mxu0 %v480_v26  ;;  %v910_v26 = vld [vmem:[#allocation5 + $0x98] sm:$0xff] }
  0xf1   :  { %1649 = vmatpush3.msra.mxu1 %v248_v18  ;;  %1662 = vmatprep.subr.mxu0 %v479_v27  ;;  %v2020_v18 = vld [vmem:[#allocation2 + $0x48] sm:$0xff] }
  0xf2   :  { %1651 = vmatmul.mubr.msk.f32.vlgmr.msra.gmra.mxu1 %vm72_vm0, %v374_v21  ;;  %1663 = vmatpush3.msra.mxu0 %v479_v27  ;;  %v698_v21 = vld [vmem:[#allocation2 + $0x20] sm:$0xff]  ;;  %v909_v27 = vld [vmem:[#allocation5 + $0x90] sm:$0xff] }
  0xf3   :  { %1653 = vmatprep.mubr.msk.f32.mxu1 %vm72_vm0, %v375_v22  ;;  %1684 = vmatprep.subr.mxu0 %v707_v28  ;;  %v699_v22 = vld [vmem:[#allocation2 + $0x28] sm:$0xff]  ;;  %v1012_v24 = vadd.f32 %v698_v21, %v698_v21 }
  0xf6   :  { %1654 = vmatmul.mubr.msk.f32.gmra.mxu1 %vm72_vm0, %v376_v23  ;;  %v700_v23 = vld [vmem:[#allocation2 + $0x30] sm:$0xff] }
  0xf7   :  { %1678 = vmatprep.mubr.msk.f32.mxu1 %vm72_vm0, %v2016_v13 }
 0x1a9   :  { %v1638_v44 = vpop.f32.mrf.mxu0 }
 0x1aa   :  { %v370_v52 = vadd.f32 %v1638_v44, %v157_v48  ;;  %v1118_v44 = vld [vmem:[#allocation5 + $0xa0] sm:$0xff] }
 0x1ab   :  { %v350_v45 = vpop.f32.mrf.mxu0 }
 0x1ac   :  { %v369_v56 = vadd.f32 %v350_v45, %v152_v49 }
 0x1ad   :  { %v1641_v47 = vpop.f32.mrf.mxu0 }
 0x1ae   :  { %v372_v59 = vadd.f32 %v1641_v47, %v167_v51 }
 0x1af   :  { %v360_v50 = vpop.f32.mrf.mxu0 }
 0x1b2   :  { %v1652_v29 = vpop.f32.mrf.mxu1 }
 0x1b3   :  { %v475_v32 = vsub.f32 %v1652_v29, %v1924_v3  ;;  %v907_v29 = vld [vmem:[#allocation5 + $0x80] sm:$0xff] }
 0x1b4   :  { %v455_v30 = vpop.f32.mrf.mxu1 }
 0x1b5   :  { %v474_v31 = vsub.f32 %v455_v30, %v1932_v6  ;;  %v2001_v6 = vld [vmem:[%s2128_s3 + $0x10] sm:$0xff] }
 0x1b6   :  { %v1655_v33 = vpop.f32.mrf.mxu1 }
 0x1b7   :  { %1664 = vmatprep.mubr.msk.f32.mxu0 %vm72_vm0, %v474_v31  ;;  %v477_v36 = vsub.f32 %v1655_v33, %v1912_v0  ;;  %v1987_v0 = vld [vmem:[%s2128_s3 + $0x18] sm:$0xff] }
 0x1b8   :  { %v465_v34 = vpop.f32.mrf.mxu1  ;;  %1665 = vmatmul.mubr.msk.f32.vlgmr.msra.gmra.mxu0 %vm72_vm0, %v475_v32 }
 0x1b9   :  { %v476_v35 = vsub.f32 %v465_v34, %v1917_v1  ;;  %1685 = vmatpush3.msra.mxu0 %v707_v28  ;;  %v371_v1 = vadd.f32 %v360_v50, %v162_v55  ;;  %v908_v28 = vld [vmem:[#allocation5 + $0x88] sm:$0xff] }
 0x1ba   :  { %1686 = vmatprep.subr.mxu0 %v706_v37 }
 0x1bb   :  { %1667 = vmatprep.mubr.msk.f32.mxu0 %vm72_vm0, %v476_v35  ;;  %1687 = vmatpush3.msra.mxu0 %v706_v37 }
 0x1bc   :  { %1668 = vmatmul.mubr.msk.f32.gmra.mxu0 %vm72_vm0, %v477_v36  ;;  %1688 = vmatprep.subr.mxu0 %v705_v38 }
 0x1bd   :  { %1689 = vmatpush3.msra.mxu0 %v705_v38  ;;  %v1013_v38 = vadd.f32 %v699_v22, %v699_v22 }
 0x1be   :  { %1690 = vmatprep.subr.mxu0 %v704_v39 }
 0x1bf   :  { %1691 = vmatpush3.msra.mxu0 %v704_v39  ;;  %v1014_v39 = vadd.f32 %v700_v23, %v700_v23 }
 0x1c0   :  { %1712 = vmatprep.subr.mxu0 %v910_v26 }
 0x278   :  { %v1666_v53 = vpop.f32.mrf.mxu0 }
 0x279   :  { %v1973_v57 = vadd.f32 %v1666_v53, %v370_v52 }
 0x27a   :  { %v561_v58 = vpop.f32.mrf.mxu0 }
 0x27b   :  { %v1975_v60 = vadd.f32 %v561_v58, %v369_v56  ;;  %v585_v61 = vmul.f32 %v1973_v57, %v1971_v54 }
 0x27c   :  { %v1669_v63 = vpop.f32.mrf.mxu0 }
 0x27d   :  { %v1989_v2 = vadd.f32 %v1669_v63, %v372_v59  ;;  %1692 = vmatprep.mubr.msk.f32.mxu0 %vm72_vm0, %v1975_v60  ;;  %v591_v3 = vsel %vm72_vm0, %v585_v61, 0.0  ;;  %v584_v5 = vmul.f32 %v1975_v60, %v1982_v62 }
 0x27e   :  { %v571_v4 = vpop.f32.mrf.mxu0  ;;  %1693 = vmatmul.mubr.msk.f32.vlgmr.msra.gmra.mxu0 %vm72_vm0, %v1973_v57  ;;  %592 = vadd.xlane.f32.xlu1 %v591_v3 }
 0x27f   :  { %v2003_v7 = vadd.f32 %v571_v4, %v371_v1  ;;  %v587_v8 = vmul.f32 %v1989_v2, %v1987_v0  ;;  %v588_v11 = vsel %vm72_vm0, %v584_v5, 0.0  ;;  %1713 = vmatpush3.msra.mxu0 %v910_v26  ;;  %v1479_v1 = vld [vmem:[%s2128_s3 + $0x28] ss:$0 sm:$0xff]  ;;  %s1871_s3 = smov [#allocation7]  }
 0x280   :  { %1714 = vmatprep.subr.mxu0 %v909_v27  ;;  %s1441_s20 = sshll.u32 %s1871_s3, 4  ;;  %s1442_s20 = int_to_ptr.vmem [resolvable:$true] %s1441_s20 }
 0x281   :  { %1695 = vmatprep.mubr.msk.f32.mxu0 %vm72_vm0, %v2003_v7  ;;  %v597_v9 = vsel %vm72_vm0, %v587_v8, 0.0  ;;  %v586_v10 = vmul.f32 %v2003_v7, %v2001_v6  ;;  %1715 = vmatpush3.msra.mxu0 %v909_v27  ;;  %s1840_s21 = scalar_lea.vmem %s1442_s20, 512  ;;  %p1845_p11 = scmp.lt.s32.totalorder %s1442_s20, %s1442_s20 }
 0x282   :  { %1696 = vmatmul.mubr.msk.f32.gmra.mxu0 %vm72_vm0, %v1989_v2  ;;  %598 = vadd.xlane.f32.xlu0 %v597_v9  ;;  %p1841_p10 = scmp.ne.s32.totalorder %s1442_s20, %s1840_s21  ;;  %p1846_p12 = scmp.lt.s32.totalorder %s1840_s21, %s1840_s21 }
 0x283   :  { %589 = vadd.xlane.f32.xlu1 %v588_v11  ;;  %v594_v12 = vsel %vm72_vm0, %v586_v10, 0.0  ;;  %1716 = vmatprep.subr.mxu0 %v908_v28 }
 0x284   :  { %1717 = vmatpush3.msra.mxu0 %v908_v28  ;;  %p1847_p13 = por %p1846_p12, %p1845_p11 }
 0x285   :  { %1718 = vmatprep.subr.mxu0 %v907_v29 }
 0x286   :  { %595 = vadd.xlane.f32.xlu0 %v594_v12  ;;  %1719 = vmatpush3.msra.mxu0 %v907_v29  ;;  %p1848_p0 = pnand %p1847_p13, %p1841_p10 }
 0x287   :  { %1740 = vmatprep.subr.mxu0 %v1121_v41 }
 0x307   :  { %v593_v15 = vpop.xlane.xlu1 %592 }
 0x30b   :  { %v599_v14 = vpop.xlane.xlu0 %598 }
 0x30c   :  { %1670 = vmatprep.subr.mxu1 %v599_v14  ;;  %v590_v17 = vpop.xlane.xlu1 %589 }
 0x30d   :  { %1671 = vmatpush3.msra.mxu1 %v599_v14 }
 0x30f   :  { %v596_v16 = vpop.xlane.xlu0 %595 }
 0x310   :  { %1672 = vmatprep.subr.mxu1 %v596_v16 }
 0x311   :  { %1673 = vmatpush3.msra.mxu1 %v596_v16 }
 0x312   :  { %1674 = vmatprep.subr.mxu1 %v593_v15 }
 0x313   :  { %1675 = vmatpush3.msra.mxu1 %v593_v15 }
 0x314   :  { %1676 = vmatprep.subr.mxu1 %v590_v17 }
 0x315   :  { %1677 = vmatpush3.msra.mxu1 %v590_v17 }
 0x316   :  { %1679 = vmatmul.mubr.msk.f32.vlgmr.msra.gmra.mxu1 %vm72_vm0, %v2020_v18  ;;  %1698 = vmatprep.subr.mxu1 %v1989_v2 }
 0x317   :  { %1699 = vmatpush3.msra.mxu1 %v1989_v2  ;;  %1681 = vmatprep.mubr.msk.f32.mxu1 %vm72_vm0, %v2022_v19 }
 0x318   :  { %1700 = vmatprep.subr.mxu1 %v2003_v7 }
 0x319   :  { %1701 = vmatpush3.msra.mxu1 %v2003_v7 }
 0x31a   :  { %1682 = vmatmul.mubr.msk.f32.gmra.mxu1 %vm72_vm0, %v2030_v20  ;;  %1702 = vmatprep.subr.mxu1 %v1973_v57 }
 0x31b   :  { %1703 = vmatpush3.msra.mxu1 %v1973_v57  ;;  %1706 = vmatprep.mubr.msk.f32.mxu1 %vm72_vm0, %v698_v21 }
 0x31c   :  { %1704 = vmatprep.subr.mxu1 %v1975_v60 }
 0x31d   :  { %1705 = vmatpush3.msra.mxu1 %v1975_v60 }
 0x31e   :  { %1707 = vmatmul.mubr.msk.f32.vlgmr.msra.gmra.mxu1 %vm72_vm0, %v699_v22 }
 0x31f   :  { %1709 = vmatprep.mubr.msk.f32.mxu1 %vm72_vm0, %v700_v23 }
 0x322   :  { %1710 = vmatmul.mubr.msk.f32.gmra.mxu1 %vm72_vm0, %v701_v25 }
 0x323   :  { %1734 = vmatprep.mubr.msk.f32.mxu1 %vm72_vm0, %v1012_v24 }
 0x33e   :  { %v1694_v53 = vpop.f32.mrf.mxu0 }
 0x33f   :  { %v796_v5 = vadd.f32 %v1694_v53, %v1479_v1 }
 0x340   :  { %v790_v55 = vpop.f32.mrf.mxu0 }
 0x341   :  { %v791_v10 = vadd.f32 %v1479_v1, %v790_v55 }
 0x342   :  { %v1697_v56 = vpop.f32.mrf.mxu0 }
 0x343   :  { %v806_v8 = vadd.f32 %v1697_v56, %v1479_v1 }
 0x344   :  { %v800_v58 = vpop.f32.mrf.mxu0 }
 0x345   :  { %v801_v11 = vadd.f32 %v1479_v1, %v800_v58 }
 0x3d6   :  { %v2045_v30 = vpop.f32.mrf.mxu1 }
 0x3d8   :  { %v2047_v31 = vpop.f32.mrf.mxu1 }
 0x3da   :  { %v2049_v32 = vpop.f32.mrf.mxu1 }
 0x3dc   :  { %v2051_v33 = vpop.f32.mrf.mxu1 }
 0x3de   :  { %v1708_v34 = vpop.f32.mrf.mxu1 }
 0x3e0   :  { %v887_v35 = vpop.f32.mrf.mxu1 }
 0x3e1   :  { %1720 = vmatprep.mubr.msk.f32.mxu0 %vm72_vm0, %v887_v35 }
 0x3e2   :  { %v1711_v36 = vpop.f32.mrf.mxu1  ;;  %1721 = vmatmul.mubr.msk.f32.vlgmr.msra.gmra.mxu0 %vm72_vm0, %v1708_v34 }
 0x3e3   :  { %1726 = vmatprep.subr.mxu1 %v1711_v36  ;;  %1741 = vmatpush3.msra.mxu0 %v1121_v41 }
 0x3e4   :  { %v897_v37 = vpop.f32.mrf.mxu1  ;;  %1727 = vmatpush3.msra.mxu1 %v1711_v36  ;;  %1742 = vmatprep.subr.mxu0 %v1120_v42 }
 0x3e5   :  { %1723 = vmatprep.mubr.msk.f32.mxu0 %vm72_vm0, %v897_v37  ;;  %1728 = vmatprep.subr.mxu1 %v897_v37 }
 0x3e6   :  { %1724 = vmatmul.mubr.msk.f32.gmra.mxu0 %vm72_vm0, %v1711_v36  ;;  %1729 = vmatpush3.msra.mxu1 %v897_v37 }
 0x3e7   :  { %1730 = vmatprep.subr.mxu1 %v1708_v34  ;;  %1743 = vmatpush3.msra.mxu0 %v1120_v42 }
 0x3e8   :  { %1731 = vmatpush3.msra.mxu1 %v1708_v34  ;;  %1744 = vmatprep.subr.mxu0 %v1119_v43 }
 0x3e9   :  { %1732 = vmatprep.subr.mxu1 %v887_v35  ;;  %1745 = vmatpush3.msra.mxu0 %v1119_v43 }
 0x3ea   :  { %1733 = vmatpush3.msra.mxu1 %v887_v35  ;;  %1746 = vmatprep.subr.mxu0 %v1118_v44 }
 0x3eb   :  { %1735 = vmatmul.mubr.msk.f32.vlgmr.msra.gmra.mxu1 %vm72_vm0, %v1013_v38  ;;  %1747 = vmatpush3.msra.mxu0 %v1118_v44 }
 0x3ec   :  { %1737 = vmatprep.mubr.msk.f32.mxu1 %vm72_vm0, %v1014_v39 }
 0x3ef   :  { %1738 = vmatmul.mubr.msk.f32.gmra.mxu1 %vm72_vm0, %v1015_v40 }
 0x3f0   :  { %1762 = vmatprep.mubr.msk.f32.mxu1 %vm72_vm0, %v2016_v13 }
 0x4a2   :  { %v1722_v59 = vpop.f32.mrf.mxu0 }
 0x4a3   :  { %v1009_v12 = vadd.f32 %v1722_v59, %v796_v5 }
 0x4a4   :  { %v989_v61 = vpop.f32.mrf.mxu0 }
 0x4a5   :  { %v1008_v15 = vadd.f32 %v989_v61, %v791_v10 }
 0x4a6   :  { %v1725_v63 = vpop.f32.mrf.mxu0 }
 0x4a7   :  { %v1011_v13 = vadd.f32 %v1725_v63, %v806_v8 }
 0x4a8   :  { %v999_v3 = vpop.f32.mrf.mxu0 }
 0x4a9   :  { %v1010_v16 = vadd.f32 %v999_v3, %v801_v11 }
 0x4ab   :  { %v1736_v45 = vpop.f32.mrf.mxu1 }
 0x4ac   :  { %v1114_v48 = vsub.f32 %v1736_v45, %v1973_v57 }
 0x4ad   :  { %v1094_v46 = vpop.f32.mrf.mxu1 }
 0x4ae   :  { %v1113_v47 = vsub.f32 %v1094_v46, %v1975_v60 }
 0x4af   :  { %v1739_v49 = vpop.f32.mrf.mxu1 }
 0x4b0   :  { %1748 = vmatprep.mubr.msk.f32.mxu0 %vm72_vm0, %v1113_v47  ;;  %v1116_v52 = vsub.f32 %v1739_v49, %v1989_v2 }
 0x4b1   :  { %v1104_v50 = vpop.f32.mrf.mxu1  ;;  %1749 = vmatmul.mubr.msk.f32.vlgmr.msra.gmra.mxu0 %vm72_vm0, %v1114_v48 }
 0x4b2   :  { %v1115_v51 = vsub.f32 %v1104_v50, %v2003_v7 }
 0x4b4   :  { %1751 = vmatprep.mubr.msk.f32.mxu0 %vm72_vm0, %v1115_v51 }
 0x4b5   :  { %1752 = vmatmul.mubr.msk.f32.gmra.mxu0 %vm72_vm0, %v1116_v52 }
 0x571   :  { %v1750_v4 = vpop.f32.mrf.mxu0 }
 0x572   :  { %v2073_v17 = vadd.f32 %v1750_v4, %v1009_v12 }
 0x573   :  { %v1200_v9 = vpop.f32.mrf.mxu0 }
 0x574   :  { %v2077_v23 = vadd.f32 %v1200_v9, %v1008_v15  ;;  %v1224_v28 = vmul.f32 %v2073_v17, %v1971_v54 }
 0x575   :  { %v1753_v14 = vpop.f32.mrf.mxu0 }
 0x576   :  { %v2075_v21 = vadd.f32 %v1753_v14, %v1011_v13  ;;  %v1223_v34 = vmul.f32 %v2077_v23, %v1982_v62  ;;  %v1230_v35 = vsel %vm72_vm0, %v1224_v28, 0.0  ;;  %v1870_v62 = vmov 0  }
 0x577   :  { %v1210_v22 = vpop.f32.mrf.mxu0  ;;  %1775 = vset.pattern.permute.xlu1 %v1870_v62  ;;  %1774 = vset.pattern.permute.xlu0 %v1870_v62 }
 0x578   :  { %v2079_v24 = vadd.f32 %v1210_v22, %v1010_v16  ;;  %v1226_v25 = vmul.f32 %v2075_v21, %v1987_v0  ;;  %v1227_v0 = vsel %vm72_vm0, %v1223_v34, 0.0 }
 0x57a   :  { %v1236_v26 = vsel %vm72_vm0, %v1226_v25, 0.0  ;;  %v1225_v27 = vmul.f32 %v2079_v24, %v2001_v6 }
 0x57b   :  { %1237 = vadd.xlane.f32.xlu0 %v1236_v26 }
 0x57c   :  { %v1233_v29 = vsel %vm72_vm0, %v1225_v27, 0.0 }
 0x57d   :  { %1234 = vadd.xlane.f32.xlu1 %v1233_v29 }
 0x57f   :  { %1231 = vadd.xlane.f32.xlu0 %v1230_v35 }
 0x581   :  { %1228 = vadd.xlane.f32.xlu1 %v1227_v0 }
 0x604   :  { %v1238_v36 = vpop.xlane.xlu0 %1237 }
 0x605   :  { %1754 = vmatprep.subr.mxu1 %v1238_v36 }
 0x606   :  { %1755 = vmatpush3.msra.mxu1 %v1238_v36  ;;  %v1235_v6 = vpop.xlane.xlu1 %1234 }
 0x607   :  { %1756 = vmatprep.subr.mxu1 %v1235_v6 }
 0x608   :  { %v1232_v37 = vpop.xlane.xlu0 %1231  ;;  %1757 = vmatpush3.msra.mxu1 %v1235_v6 }
 0x609   :  { %1758 = vmatprep.subr.mxu1 %v1232_v37 }
 0x60a   :  { %1759 = vmatpush3.msra.mxu1 %v1232_v37  ;;  %v1229_v54 = vpop.xlane.xlu1 %1228 }
 0x60b   :  { %1760 = vmatprep.subr.mxu1 %v1229_v54 }
 0x60c   :  { %1761 = vmatpush3.msra.mxu1 %v1229_v54 }
 0x60d   :  { %1763 = vmatmul.mubr.msk.f32.vlgmr.msra.gmra.mxu1 %vm72_vm0, %v2020_v18 }
 0x60e   :  { %1765 = vmatprep.mubr.msk.f32.mxu1 %vm72_vm0, %v2022_v19 }
 0x611   :  { %1766 = vmatmul.mubr.msk.f32.gmra.mxu1 %vm72_vm0, %v2030_v20 }
 0x6cd   :  { %v1764_v38 = vpop.f32.mrf.mxu1 }
 0x6ce   :  { %v1325_v39 = vmax.f32 %v2045_v30, %v1764_v38 }
 0x6cf   :  { %v1305_v40 = vpop.f32.mrf.mxu1 }
 0x6d0   :  { %v1329_v41 = vsub.f32 %v2045_v30, %v1325_v39  ;;  %v1341_v42 = vsub.f32 %v1764_v38, %v1325_v39  ;;  %v1324_v43 = vmax.f32 %v2047_v31, %v1305_v40 }
 0x6d1   :  { %v1767_v44 = vpop.f32.mrf.mxu1 }
 0x6d2   :  { %v1334_v18 = vmul.f32 1.442695, %v1329_v41  ;;  %v1346_v45 = vmul.f32 1.442695, %v1341_v42  ;;  %v1328_v19 = vsub.f32 %v2047_v31, %v1324_v43  ;;  %v1340_v46 = vsub.f32 %v1305_v40, %v1324_v43 }
 0x6d3   :  { %v1327_v20 = vmax.f32 %v2049_v32, %v1767_v44  ;;  %v1315_v47 = vpop.f32.mrf.mxu1 }
 0x6d4   :  { %1776 = vpow2.f32 %v1334_v18  ;;  %v1332_v48 = vmul.f32 1.442695, %v1328_v19  ;;  %v1344_v49 = vmul.f32 1.442695, %v1340_v46  ;;  %v1326_v50 = vmax.f32 %v2051_v33, %v1315_v47 }
 0x6d5   :  { %1778 = vpow2.f32 %v1346_v45  ;;  %v1331_v30 = vsub.f32 %v2049_v32, %v1327_v20  ;;  %v1343_v51 = vsub.f32 %v1767_v44, %v1327_v20 }
 0x6d6   :  { %1780 = vpow2.f32 %v1332_v48  ;;  %v1330_v52 = vsub.f32 %v2051_v33, %v1326_v50  ;;  %v1342_v53 = vsub.f32 %v1315_v47, %v1326_v50 }
 0x6d7   :  { %1782 = vpow2.f32 %v1344_v49  ;;  %v1338_v55 = vmul.f32 1.442695, %v1331_v30  ;;  %v1350_v31 = vmul.f32 1.442695, %v1343_v51 }
 0x6d8   :  { %v1336_v56 = vmul.f32 1.442695, %v1330_v52  ;;  %v1348_v58 = vmul.f32 1.442695, %v1342_v53 }
 0x6d9   :  { %1784 = vpow2.f32 %v1338_v55 }
 0x6da   :  { %1786 = vpow2.f32 %v1350_v31 }
 0x6db   :  { %1788 = vpow2.f32 %v1336_v56 }
 0x6dc   :  { %1790 = vpow2.f32 %v1348_v58 }
 0x6e1   :  { %v1777_v59 = vpop.eup %1776 }
 0x6e2   :  { %v1779_v61 = vpop.eup %1778 }
 0x6e3   :  { %v1781_v63 = vpop.eup %1780  ;;  %v1353_v1 = vadd.f32 %v1779_v61, %v1777_v59 }
 0x6e4   :  { %v1783_v3 = vpop.eup %1782 }
 0x6e5   :  { %1792 = vrcp.f32 %v1353_v1  ;;  %v1352_v32 = vadd.f32 %v1783_v3, %v1781_v63 }
 0x6e6   :  { %v1785_v4 = vpop.eup %1784 }
 0x6e7   :  { %v1787_v5 = vpop.eup %1786  ;;  %1794 = vrcp.f32 %v1352_v32 }
 0x6e8   :  { %v1789_v33 = vpop.eup %1788  ;;  %v1355_v8 = vadd.f32 %v1787_v5, %v1785_v4 }
 0x6e9   :  { %v1791_v9 = vpop.eup %1790 }
 0x6ea   :  { %1796 = vrcp.f32 %v1355_v8  ;;  %v1354_v10 = vadd.f32 %v1791_v9, %v1789_v33 }
 0x6ec   :  { %1798 = vrcp.f32 %v1354_v10 }
 0x6f2   :  { %v1793_v11 = vpop.eup %1792 }
 0x6f3   :  { %v1361_v12 = vmul.f32 %v1793_v11, %v1353_v1 }
 0x6f4   :  { %v1795_v13 = vpop.eup %1794 }
 0x6f5   :  { %v1365_v14 = vsub.f32 2.0, %v1361_v12  ;;  %v1360_v15 = vmul.f32 %v1795_v13, %v1352_v32 }
 0x6f7   :  { %v1797_v16 = vpop.eup %1796  ;;  %v1369_v22 = vmul.f32 %v1793_v11, %v1365_v14  ;;  %v1364_v25 = vsub.f32 2.0, %v1360_v15 }
 0x6f8   :  { %v1363_v28 = vmul.f32 %v1797_v16, %v1355_v8 }
 0x6f9   :  { %v1373_v26 = vmul.f32 %v1777_v59, %v1369_v22  ;;  %v1368_v27 = vmul.f32 %v1795_v13, %v1364_v25  ;;  %v1799_v29 = vpop.eup %1798  ;;  %v1401_v35 = vmul.f32 %v1779_v61, %v1369_v22 }
 0x6fa   :  { %v1367_v0 = vsub.f32 2.0, %v1363_v28  ;;  %v1362_v36 = vmul.f32 %v1799_v29, %v1354_v10 }
 0x6fb   :  { %1383 = vperm.xlu1 %1775, %v1373_v26   ;;  %v1372_v34 = vmul.f32 %v1781_v63, %v1368_v27  ;;  %v1400_v6 = vmul.f32 %v1783_v3, %v1368_v27 }
 0x6fc   :  { %v1371_v37 = vmul.f32 %v1797_v16, %v1367_v0  ;;  %v1366_v54 = vsub.f32 2.0, %v1362_v36 }
 0x6fd   :  { %1378 = vperm.xlu0 %1774, %v1372_v34  }
 0x6fe   :  { %v1375_v62 = vmul.f32 %v1785_v4, %v1371_v37  ;;  %v1370_v38 = vmul.f32 %v1799_v29, %v1366_v54  ;;  %v1403_v41 = vmul.f32 %v1787_v5, %v1371_v37 }
 0x6ff   :  { %1411 = vperm.xlu1 %1775, %v1401_v35  }
 0x700   :  { %v1374_v39 = vmul.f32 %v1789_v33, %v1370_v38  ;;  %v1402_v40 = vmul.f32 %v1791_v9, %v1370_v38 }
 0x703   :  { %1406 = vperm.xlu1 %1775, %v1400_v6  }
 0x707   :  { %1393 = vperm.xlu1 %1775, %v1375_v62  }
 0x70b   :  { %1388 = vperm.xlu1 %1775, %v1374_v39  }
 0x70f   :  { %1416 = vperm.xlu1 %1775, %v1402_v40  }
 0x713   :  { %1421 = vperm.xlu1 %1775, %v1403_v41  }
 0x776   :  { %v1384_v42 = vpop.permute.xlu1 %1383 }
 0x777   :  { %v1397_v44 = vmul.f32 %v1384_v42, %v1973_v57 }
 0x778   :  { %v1379_v45 = vpop.permute.xlu0 %1378 }
 0x779   :  { %v1396_v20 = vmul.f32 %v1379_v45, %v1975_v60 }
 0x77a   :  { %v1412_v43 = vpop.permute.xlu1 %1411 }
 0x77b   :  { %v1425_v18 = vmul.f32 %v1412_v43, %v2073_v17 }
 0x77d   :  { %v1429_v19 = vadd.f32 %v1425_v18, %v1397_v44 }
 0x77e   :  { %v1407_v46 = vpop.permute.xlu1 %1406 }
 0x77f   :  { %1433 = vst.msk [vmem:[#allocation7 + $0x8] sm:$0xff] %vm72_vm0, %v1429_v19  ;;  %v1424_v47 = vmul.f32 %v1407_v46, %v2077_v23 }
 0x781   :  { %v1428_v48 = vadd.f32 %v1424_v47, %v1396_v20 }
 0x782   :  { %v1394_v49 = vpop.permute.xlu1 %1393 }
 0x783   :  { %1432 = vst.msk [vmem:[#allocation7] sm:$0xff] %vm72_vm0, %v1428_v48  ;;  %v1399_v60 = vmul.f32 %v1394_v49, %v1989_v2 }
 0x786   :  { %v1389_v50 = vpop.permute.xlu1 %1388 }
 0x787   :  { %v1398_v51 = vmul.f32 %v1389_v50, %v2003_v7 }
 0x78a   :  { %v1417_v30 = vpop.permute.xlu1 %1416 }
 0x78b   :  { %v1426_v57 = vmul.f32 %v1417_v30, %v2079_v24 }
 0x78d   :  { %v1430_v17 = vadd.f32 %v1426_v57, %v1398_v51 }
 0x78e   :  { %v1422_v52 = vpop.permute.xlu1 %1421 }
 0x78f   :  { %1434 = vst.msk [vmem:[#allocation7 + $0x10] sm:$0xff] %vm72_vm0, %v1430_v17  ;;  %v1427_v23 = vmul.f32 %v1422_v52, %v2075_v21 }
 0x791   :  { %v1431_v53 = vadd.f32 %v1427_v23, %v1399_v60 }
 0x793   :  { %1435 = vst.msk [vmem:[#allocation7 + $0x18] sm:$0xff] %vm72_vm0, %v1431_v53 }
 0x794   :  { %1851 = shalt.err (!%p1848_p0)
}
 0x795   :  { %1447 = dma.vmem_to_hbm [thread:$0]  %s1442_s20, 512, %s2129_s4, [#allocation4], %s1867_s18, %s1867_s18, %s1868_s19  }
 0x796   :  { %1864 = dma.done.wait [#allocation4], 512  }
 0x797   :  { %1865 = vsyncadd [#allocation4], 4294966784 }
 0x798   :  { %1451 = vsyncpa [#allocation3], 1 }
 0x799   :  { %1452 = vsyncpa [#allocation6], 1 }
 0x79a   :  { %1453 = vsyncpa [#allocation4], 1 }

</bundles_post_ra>
